<compile_context>
chip_gen: v6e
topology: v6e:2x2x1
jax: 0.10.0
libtpu: 0.0.40
codegen_flags: <defaults>
</compile_context>

<pallas_src>
import functools

import jax
import jax.numpy as jnp
import numpy as np
from jax.experimental import pallas as pl
from jax.experimental.pallas import tpu as pltpu

# Module hyper-parameters (kwargs of the ConvTranspose2d): a typical 2x upsampler.
IN_CHANNELS = 4
OUT_CHANNELS = 8
KERNEL_SIZE = 3
STRIDE = 2
PADDING = 1
OUTPUT_PADDING = 1
EPS = 1e-5            # InstanceNorm2d default
ADD_ACTIVATION = True


def _upsample_conv_kernel(x_ref, w_ref, b_ref, o_ref, *, eps, relu, n_par, co):
    """One batch element per grid step; channels-first, spatial on lanes.

    x_ref : (1, 4*Ci, H*W)   4 shifted copies of the input stacked on channels
    w_ref : (4*Co, 4*Ci)     sub-pixel weight matrix (rows = (parity, co))
    b_ref : (4*Co, 1)        bias pre-tiled over the 4 parities
    o_ref : (1, 4*Co, H*W)   sub-pixel outputs; wrapper interleaves to (Co, 2H, 2W)
    """
    x = x_ref[0]                                    # (4*Ci, HW)  lane-dense
    w = w_ref[...]                                  # (4*Co, 4*Ci)

    # Single MXU matmul: contraction over the 4*Ci stacked (shifted) input channels.
    r = jnp.dot(w, x, preferred_element_type=jnp.float32) + b_ref[...]   # (4*Co, HW)

    hw = r.shape[1]
    inv_n = 1.0 / (n_par * hw)

    # Fused InstanceNorm2d (affine=False), biased variance, all f32.
    # Lane reduction on the big tensor, then a tiny (n_par, Co) sublane fold.
    s1 = jnp.sum(r, axis=1, keepdims=True)                    # (4*Co, 1)
    s2 = jnp.sum(r * r, axis=1, keepdims=True)                # (4*Co, 1)
    s1 = jnp.sum(s1.reshape(n_par, co, 1), axis=0)            # (Co, 1)
    s2 = jnp.sum(s2.reshape(n_par, co, 1), axis=0)            # (Co, 1)
    mean = s1 * inv_n
    var = jnp.maximum(s2 * inv_n - mean * mean, 0.0)
    scale = jax.lax.rsqrt(var + eps)                          # rsqrt -> EUP slot

    mean_t = jnp.tile(mean, (n_par, 1))                       # (4*Co, 1)
    scale_t = jnp.tile(scale, (n_par, 1))                     # (4*Co, 1)
    y = (r - mean_t) * scale_t                                # broadcast over lanes

    if relu:
        y = jnp.maximum(y, 0.0)
    o_ref[0] = y.astype(o_ref.dtype)                          # dense 256-lane store


def _build_subpixel_weight(weight):
    """(Ci, Co, K, K) ConvTranspose2d weight -> (4*Co, 4*Ci) sub-pixel matmul matrix.

    Row index    = (parity_y*2 + parity_x) * Co + co
    Column index = (shift_y*2 + shift_x) * Ci + ci
    For stride=2 / K=3 / padding=1: even output rows/cols use kernel tap 1; odd output
    rows/cols use tap 2 (input shift 0) and tap 0 (input shift +1).
    """
    Ci, Co, K, _ = weight.shape
    kmap = {(0, 0): 1, (1, 0): 2, (1, 1): 0}        # (parity, shift) -> kernel tap
    zero_blk = jnp.zeros((Co, Ci), weight.dtype)
    rows = []
    for py in (0, 1):
        for px in (0, 1):
            blocks = []
            for dy in (0, 1):
                for dx in (0, 1):
                    if (py, dy) in kmap and (px, dx) in kmap:
                        kh, kw = kmap[(py, dy)], kmap[(px, dx)]
                        blocks.append(weight[:, :, kh, kw].T)       # (Co, Ci)
                    else:
                        blocks.append(zero_blk)
            rows.append(jnp.concatenate(blocks, axis=1))            # (Co, 4*Ci)
    return jnp.concatenate(rows, axis=0)                            # (4*Co, 4*Ci)


def upsampling_convolutional_block(x_nchw, weight, bias, *, stride=STRIDE,
                                   padding=PADDING, output_padding=OUTPUT_PADDING,
                                   eps=EPS, add_activation=ADD_ACTIVATION):
    """Forward pass of UpSamplingConvolutionalBlock.

    x_nchw : (N, Ci, H, W)
    weight : (Ci, Co, K, K)   (PyTorch ConvTranspose2d weight layout)
    bias   : (Co,)
    returns: (N, Co, Hout, Wout)
    """
    N, Ci, H, W = x_nchw.shape
    Ci_w, Co, K, K2 = weight.shape
    assert Ci == Ci_w and K == K2
    # TODO(synk): the sub-pixel decomposition below is specialized to the standard 2x
    # upsampler config (K=3, stride=2, padding=1, output_padding=1) of this block.
    assert (K, stride, padding, output_padding) == (3, 2, 1, 1)

    Hout = (H - 1) * stride - 2 * padding + K + output_padding
    Wout = (W - 1) * stride - 2 * padding + K + output_padding
    assert (Hout, Wout) == (2 * H, 2 * W)
    HW = H * W
    N_PAR = 4

    # ---- glue (plain JAX): 4 shifted views of x, stacked on channels, spatial flat ----
    # (no zero-inserted / dilated tensor is materialized; every element is used)
    xpad = jnp.pad(x_nchw, ((0, 0), (0, 0), (0, 1), (0, 1)))
    x_stack = jnp.concatenate(
        [xpad[:, :, dy:dy + H, dx:dx + W] for dy in (0, 1) for dx in (0, 1)],
        axis=1).reshape(N, N_PAR * Ci, HW)                          # (N, 16, 256)

    w_all = _build_subpixel_weight(weight)                          # (32, 16)
    b_tiled = jnp.tile(bias.reshape(Co, 1), (N_PAR, 1))             # (32, 1)

    kernel = functools.partial(_upsample_conv_kernel, eps=eps,
                               relu=add_activation, n_par=N_PAR, co=Co)

    out_sub = pl.pallas_call(
        kernel,
        out_shape=jax.ShapeDtypeStruct((N, N_PAR * Co, HW), jnp.float32),
        grid_spec=pltpu.PrefetchScalarGridSpec(
            num_scalar_prefetch=0,
            grid=(N,),
            in_specs=[
                pl.BlockSpec((1, N_PAR * Ci, HW), lambda n: (n, 0, 0)),
                pl.BlockSpec((N_PAR * Co, N_PAR * Ci), lambda n: (0, 0)),
                pl.BlockSpec((N_PAR * Co, 1), lambda n: (0, 0)),
            ],
            out_specs=pl.BlockSpec((1, N_PAR * Co, HW), lambda n: (n, 0, 0)),
        ),
        compiler_params=pltpu.CompilerParams(dimension_semantics=("parallel",)),
    )(x_stack, w_all, b_tiled)

    # Pixel-shuffle interleave: (N, py, px, Co, H, W) -> (N, Co, 2H, 2W)  (NCHW output).
    out = out_sub.reshape(N, 2, 2, Co, H, W)
    out = jnp.transpose(out, (0, 3, 4, 1, 5, 2)).reshape(N, Co, Hout, Wout)
    return out


def _reference(x_nchw, weight, bias, *, stride, padding, output_padding, eps,
               add_activation):
    """Pure-JAX reference (ConvTranspose2d + InstanceNorm2d + ReLU), NCHW."""
    Ci, Co, K, _ = weight.shape
    w_flip = jnp.transpose(weight[:, :, ::-1, ::-1], (1, 0, 2, 3))  # OIHW regular conv
    pad = K - 1 - padding
    y = jax.lax.conv_general_dilated(
        x_nchw, w_flip, window_strides=(1, 1),
        padding=((pad, pad + output_padding), (pad, pad + output_padding)),
        lhs_dilation=(stride, stride),
        dimension_numbers=("NCHW", "OIHW", "NCHW"))
    y = y + bias[None, :, None, None]
    mean = jnp.mean(y, axis=(2, 3), keepdims=True)
    var = jnp.mean((y - mean) ** 2, axis=(2, 3), keepdims=True)
    y = (y - mean) / jnp.sqrt(var + eps)
    if add_activation:
        y = jnp.maximum(y, 0.0)
    return y


if __name__ == "__main__":
    key = jax.random.PRNGKey(0)
    kx, kw, kb = jax.random.split(key, 3)

    N, H, W = 2, 16, 16
    x = jax.random.normal(kx, (N, IN_CHANNELS, H, W), jnp.float32)

    # deterministic parameter init (PyTorch-like uniform bound for ConvTranspose2d)
    fan_in = IN_CHANNELS * KERNEL_SIZE * KERNEL_SIZE
    bound = 1.0 / np.sqrt(fan_in)
    weight = jax.random.uniform(kw, (IN_CHANNELS, OUT_CHANNELS, KERNEL_SIZE, KERNEL_SIZE),
                                jnp.float32, -bound, bound)
    bias = jax.random.uniform(kb, (OUT_CHANNELS,), jnp.float32, -bound, bound)

    out = upsampling_convolutional_block(x, weight, bias)
    out = jax.block_until_ready(out)

    ref = _reference(x, weight, bias, stride=STRIDE, padding=PADDING,
                     output_padding=OUTPUT_PADDING, eps=EPS,
                     add_activation=ADD_ACTIVATION)
    np.testing.assert_allclose(np.asarray(out), np.asarray(ref), rtol=1e-4, atol=1e-4)

    print("KERNEL_OK")
</pallas_src>

<mosaic_0001>
module attributes {stable_mosaic.version = 11 : i64} {
  func.func @_upsample_conv_kernel(%arg0: i32, %arg1: memref<1x16x256xf32, #tpu.memory_space<vmem>>, %arg2: memref<32x16xf32, #tpu.memory_space<vmem>>, %arg3: memref<32x1xf32, #tpu.memory_space<vmem>>, %arg4: memref<1x32x256xf32, #tpu.memory_space<vmem>>) attributes {dimension_semantics = [#tpu.dimension_semantics<parallel>], iteration_bounds = array<i64: 2>, scalar_prefetch = 0 : i64, scratch_operands = 0 : i64, tpu.core_type = #tpu.core_type<tc>, window_params = [{transform_indices = @transform_0, window_bounds = array<i64: 1, 16, 256>}, {pipeline_mode = #tpu.pipeline_mode<synchronous>, transform_indices = @transform_1, window_bounds = array<i64: 32, 16>}, {pipeline_mode = #tpu.pipeline_mode<synchronous>, transform_indices = @transform_2, window_bounds = array<i64: 32, 1>}, {transform_indices = @transform_3, window_bounds = array<i64: 1, 32, 256>}]} {
    %c0 = arith.constant 0 : index
    %c0_0 = arith.constant 0 : index
    %c0_1 = arith.constant 0 : index
    %0 = vector.load %arg1[%c0, %c0_0, %c0_1] : memref<1x16x256xf32, #tpu.memory_space<vmem>>, vector<1x16x256xf32>
    %1 = vector.shape_cast %0 : vector<1x16x256xf32> to vector<16x256xf32>
    %c0_2 = arith.constant 0 : index
    %c0_3 = arith.constant 0 : index
    %2 = vector.load %arg2[%c0_2, %c0_3] : memref<32x16xf32, #tpu.memory_space<vmem>>, vector<32x16xf32>
    %cst = arith.constant dense<0.000000e+00> : vector<32x256xf32>
    %3 = tpu.matmul %2, %1, %cst {dimension_numbers = #tpu.dot_dimension_numbers<[1], [0], [0], [1], [0, 0, 1, 1], [], []>} : vector<32x16xf32>, vector<16x256xf32>, vector<32x256xf32> -> vector<32x256xf32>
    %c0_4 = arith.constant 0 : index
    %c0_5 = arith.constant 0 : index
    %4 = vector.load %arg3[%c0_4, %c0_5] : memref<32x1xf32, #tpu.memory_space<vmem>>, vector<32x1xf32>
    %5 = vector.broadcast %4 : vector<32x1xf32> to vector<32x256xf32>
    %6 = arith.addf %3, %5 : vector<32x256xf32>
    %cst_6 = arith.constant dense<0.000000e+00> : vector<32xf32>
    %7 = vector.multi_reduction <add>, %6, %cst_6 [1] : vector<32x256xf32> to vector<32xf32>
    %8 = vector.shape_cast %7 : vector<32xf32> to vector<32x1xf32>
    %9 = arith.mulf %6, %6 : vector<32x256xf32>
    %cst_7 = arith.constant dense<0.000000e+00> : vector<32xf32>
    %10 = vector.multi_reduction <add>, %9, %cst_7 [1] : vector<32x256xf32> to vector<32xf32>
    %11 = vector.shape_cast %10 : vector<32xf32> to vector<32x1xf32>
    %12 = vector.shape_cast %8 : vector<32x1xf32> to vector<4x8x1xf32>
    %cst_8 = arith.constant dense<0.000000e+00> : vector<8x1xf32>
    %13 = vector.multi_reduction <add>, %12, %cst_8 [0] : vector<4x8x1xf32> to vector<8x1xf32>
    %14 = vector.shape_cast %11 : vector<32x1xf32> to vector<4x8x1xf32>
    %cst_9 = arith.constant dense<0.000000e+00> : vector<8x1xf32>
    %15 = vector.multi_reduction <add>, %14, %cst_9 [0] : vector<4x8x1xf32> to vector<8x1xf32>
    %cst_10 = arith.constant 9.765625E-4 : f32
    %16 = vector.broadcast %cst_10 : f32 to vector<8x1xf32>
    %17 = arith.mulf %13, %16 : vector<8x1xf32>
    %cst_11 = arith.constant 9.765625E-4 : f32
    %18 = vector.broadcast %cst_11 : f32 to vector<8x1xf32>
    %19 = arith.mulf %15, %18 : vector<8x1xf32>
    %20 = arith.mulf %17, %17 : vector<8x1xf32>
    %21 = arith.subf %19, %20 : vector<8x1xf32>
    %cst_12 = arith.constant 0.000000e+00 : f32
    %22 = vector.broadcast %cst_12 : f32 to vector<8x1xf32>
    %23 = arith.maximumf %21, %22 : vector<8x1xf32>
    %cst_13 = arith.constant 9.99999974E-6 : f32
    %24 = vector.broadcast %cst_13 : f32 to vector<8x1xf32>
    %25 = arith.addf %23, %24 : vector<8x1xf32>
    %26 = math.rsqrt %25 : vector<8x1xf32>
    %27 = tpu.concatenate %17, %17, %17, %17 in 0 : vector<8x1xf32>, vector<8x1xf32>, vector<8x1xf32>, vector<8x1xf32> -> vector<32x1xf32>
    %28 = tpu.concatenate %26, %26, %26, %26 in 0 : vector<8x1xf32>, vector<8x1xf32>, vector<8x1xf32>, vector<8x1xf32> -> vector<32x1xf32>
    %29 = vector.broadcast %27 : vector<32x1xf32> to vector<32x256xf32>
    %30 = arith.subf %6, %29 : vector<32x256xf32>
    %31 = vector.broadcast %28 : vector<32x1xf32> to vector<32x256xf32>
    %32 = arith.mulf %30, %31 : vector<32x256xf32>
    %cst_14 = arith.constant 0.000000e+00 : f32
    %33 = vector.broadcast %cst_14 : f32 to vector<32x256xf32>
    %34 = arith.maximumf %32, %33 : vector<32x256xf32>
    %c0_15 = arith.constant 0 : index
    %c0_16 = arith.constant 0 : index
    %c0_17 = arith.constant 0 : index
    %35 = vector.load %arg4[%c0_15, %c0_16, %c0_17] : memref<1x32x256xf32, #tpu.memory_space<vmem>>, vector<1x32x256xf32>
    %36 = vector.shape_cast %35 : vector<1x32x256xf32> to vector<32x256xf32>
    %37 = vector.shape_cast %34 : vector<32x256xf32> to vector<1x32x256xf32>
    tpu.vector_store %arg4[%c0_15, %c0_16, %c0_17], %37 {strides = array<i32>} : memref<1x32x256xf32, #tpu.memory_space<vmem>>, vector<1x32x256xf32>,
    return
  }
  func.func @transform_0(%arg0: i32) -> (i32, i32, i32) {
    %c0_i32 = arith.constant 0 : i32
    %c0_i32_0 = arith.constant 0 : i32
    %c0_i32_1 = arith.constant 0 : i32
    return %arg0, %c0_i32, %c0_i32_0 : i32, i32, i32
  }
  func.func @transform_1(%arg0: i32) -> (i32, i32) {
    %c0_i32 = arith.constant 0 : i32
    %c0_i32_0 = arith.constant 0 : i32
    %c0_i32_1 = arith.constant 0 : i32
    return %c0_i32, %c0_i32_0 : i32, i32
  }
  func.func @transform_2(%arg0: i32) -> (i32, i32) {
    %c0_i32 = arith.constant 0 : i32
    %c0_i32_0 = arith.constant 0 : i32
    %c0_i32_1 = arith.constant 0 : i32
    return %c0_i32, %c0_i32_0 : i32, i32
  }
  func.func @transform_3(%arg0: i32) -> (i32, i32, i32) {
    %c0_i32 = arith.constant 0 : i32
    %c0_i32_0 = arith.constant 0 : i32
    %c0_i32_1 = arith.constant 0 : i32
    return %arg0, %c0_i32, %c0_i32_0 : i32, i32, i32
  }
}

</mosaic_0001>

<bundles_post_ra>
// kernel: tpu_custom_call.1
= control target key start
LH: loop header
LB: loop body
LE: loop exit
PB: predicated region body
PF: predicated region fallthrough
CT: control target
= control target key end

     0   :  { %8 = vsyncpa [#allocation3], 0  ;;  %s792_s0 = inlined_call_operand.vmem [shape: f32[2,16,256], index: 0, kind: input, shape index: {}]   ;;  %s793_s1 = inlined_call_operand.vmem [shape: f32[32,16], index: 1, kind: input, shape index: {}]   ;;  %s794_s2 = inlined_call_operand.vmem [shape: f32[32,1], index: 2, kind: input, shape index: {}]   ;;  %s795_s3 = inlined_call_operand.hbm [shape: f32[2,32,256], index: 3, kind: output, shape index: {}]  }
   0x1   :  { %10 = vsyncpa [#allocation3 + $0x1], 0  ;;  %s622_s12 = smov 0   ;;  %s624_s13 = smov 0  }
   0x2   :  { %s626_s14 = smov 0   ;;  %s628_s15 = smov 0  }
   0x3 LB: > { %s643_s16 = sadd.s32 4294967295, %s595_s15   ;;  %s466_s17 = sadd.s32 4294967294, %s595_s15   ;;  %s595_s15 = sphi %s628_s15, %s801_s15   ;;  %s591_s14 = sphi %s626_s14, %s800_s14   ;;  %s587_s13 = sphi %s624_s13, %s799_s13   ;;  %s583_s12 = sphi %s622_s12, %s798_s12  }
   0x4   : > { %s647_s18 = sadd.s32 1, %s595_s15   ;;  %s91_s19 = sadd.s32 1, %s591_s14 }
   0x5   : > { %s88_s20 = ssub.s32 %s595_s15, %s647_s18  ;;  %p101_p0 = scmp.ne.s32.totalorder %s591_s14, %s587_s13 }
   0x6   : > { %p89_p1 = scmp.eq.s32.totalorder %s88_s20, 0  ;;  %p102_p2 = scmp.eq.s32.totalorder %s643_s16, 1 }
   0x7   : > { %p107_p3 = scmp.ne.s32.totalorder %s587_s13, %s583_s12  ;;  %p108_p4 = scmp.eq.s32.totalorder %s466_s17, 1 }
   0x8   : > { %s658_s21 = scalar_select %p89_p1, %s591_s14, %s91_s19  }
   0x9   : > { %p660_p5 = por %p102_p2, %p101_p0  ;;  %p664_p6 = por %p108_p4, %p107_p3 }
   0xa   : > { %p469_p7 = scmp.ge.s32.totalorder %s595_s15, 1  ;;  %p140_p8 = scmp.lt.s32.totalorder %s595_s15, 3 }
   0xc   : > { %p141_p9 = pnand %p469_p7, %p140_p8 }
   0xd   : > { %p164_p10 = scmp.lt.s32.totalorder (!%p141_p9), %s643_s16, 1  ;;  %s161_s27 = sand.u32 (!%p141_p9), 1, %s587_s13  }
   0xe   : > { %144 = sbr.rel (%p141_p9) target bundleno = 550 (0x226), region = 32  ;;  %s599_s9 = smov (!%p141_p9), [#allocation2]  }
   0xf   : > { %s539_s10 = sshll.u32 (!%p141_p9), %s599_s9, 4  ;;  %s540_s10 = int_to_ptr.vmem [resolvable:$false] %s539_s10 }
  0x10   : > { %s541_s11 = scalar_lea.vmem (!%p141_p9), %s540_s10, 2048 }
  0x13   : > { %v597_v0 = vmov 0.0   ;;  %v177_v1 = vld [vmem:[%s794_s2] sm:$0xff]  ;;  %v179_v2 = vld [vmem:[%s794_s2 + $0x10] sm:$0xff]  ;;  %s165_s28 = scalar_select %p164_p10, %s643_s16, 1  ;;  %v598_v3 = vmov 0   ;;  %vm201_vm0 = vcmask 130048  }
  0x14   : > { %278 = vmatprep.mubr.f32.mxu0 %v597_v0  ;;  %290 = vmatprep.mubr.f32.mxu1 %v597_v0  ;;  %v173_v8 = vld [vmem:[%s793_s1] sm:$0xff]  ;;  %v175_v9 = vld [vmem:[%s793_s1 + $0x10] sm:$0xff]  ;;  %v178_v10 = vld [vmem:[%s794_s2 + $0x8] sm:$0xff] }
  0x15   : > { %531 = vset.pattern.permute.xlu0 %v598_v3  ;;  %532 = vset.pattern.permute.xlu1 %v598_v3  ;;  %s482_s29 = sshll.u32 %s165_s28, 5  ;;  %v180_v11 = vld [vmem:[%s794_s2 + $0x18] sm:$0xff]  ;;  %v174_v12 = vld [vmem:[%s793_s1 + $0x8] sm:$0xff]  ;;  %s470_s28 = sshll.u32 %s161_s27, 6 }
  0x16   : > { %183 = vperm.xlu0 %531, %v177_v1   ;;  %193 = vperm.xlu1 %532, %v179_v2   ;;  %s168_s5 = scalar_lea.vmem %s792_s0, %s482_s29  ;;  %v176_v13 = vld [vmem:[%s793_s1 + $0x18] sm:$0xff]  ;;  %s483_s29 = sshll.u32 %s643_s16, 10 }
  0x17   : > { %v172_v4 = vld [vmem:[%s168_s5 + $0x18] sm:$0xff]  ;;  %v171_v5 = vld [vmem:[%s168_s5 + $0x10] sm:$0xff]  ;;  %v170_v6 = vld [vmem:[%s168_s5 + $0x8] sm:$0xff]  ;;  %s163_s30 = scalar_lea.vmem [#allocation2], %s470_s28  ;;  %s746_s7 = scalar_lea.hbm %s795_s3, %s483_s29 }
  0x18   : > { %242 = vmatprep.subr.mxu0 %v172_v4  ;;  %484 = vmatprep.subr.mxu1 %v172_v4  ;;  %v169_v7 = vld [vmem:[%s168_s5] sm:$0xff]  ;;  %s404_s4 = sshll.u32 %s163_s30, 4  ;;  %s752_s16 = scalar_lea.sflag [#allocation3], %s161_s27  ;;  %s748_s4 = int_to_ptr.vmem [resolvable:$true] %s404_s4 }
  0x19   : > { %243 = vmatpush1.msra.mxu0 %v171_v5  ;;  %486 = vmatpush1.msra.mxu1 %v171_v5  ;;  %s535_s8 = scalar_lea.vmem %s748_s4, 1024  ;;  %p542_p0 = scmp.lt.s32.totalorder %s748_s4, %s540_s10 }
  0x1a   : > { %244 = vmatprep.subr.mxu0 %v170_v6  ;;  %485 = vmatprep.subr.mxu1 %v170_v6  ;;  %p536_p11 = scmp.ne.s32.totalorder %s748_s4, %s535_s8  ;;  %p543_p1 = scmp.lt.s32.totalorder %s541_s11, %s535_s8 }
  0x1b   : > { %245 = vmatpush1.msra.mxu0 %v169_v7  ;;  %487 = vmatpush1.msra.mxu1 %v169_v7 }
  0x1c   : > { %473 = vmatmul.mubr.msk.f32.vlgmr.msra.gmra.mxu0 %vm201_vm0, %v173_v8  ;;  %475 = vmatmul.mubr.msk.f32.vlgmr.msra.gmra.mxu1 %vm201_vm0, %v175_v9  ;;  %p537_p12 = pnand %p536_p11, %p660_p5  ;;  %p544_p2 = por %p543_p1, %p542_p0 }
  0x1d   : > { %284 = vmatprep.mubr.f32.mxu0 %v597_v0  ;;  %296 = vmatprep.mubr.f32.mxu1 %v597_v0 }
  0x1e   : > { %188 = vperm.xlu0 %531, %v178_v10   ;;  %198 = vperm.xlu1 %532, %v180_v11   ;;  %p538_p13 = pneg %p537_p12 }
  0x20   : > { %474 = vmatmul.mubr.msk.f32.gmra.mxu0 %vm201_vm0, %v174_v12  ;;  %476 = vmatmul.mubr.msk.f32.gmra.mxu1 %vm201_vm0, %v176_v13  ;;  %p545_p3 = pnand %p544_p2, %p538_p13 }
  0x91   : > { %v184_v14 = vpop.permute.xlu0 %183  ;;  %v194_v20 = vpop.permute.xlu1 %193 }
  0x99   : > { %v189_v24 = vpop.permute.xlu0 %188  ;;  %v199_v31 = vpop.permute.xlu1 %198 }
  0xdc   : > { %v280_v15 = vpop.f32.mrf.mxu0  ;;  %v292_v16 = vpop.f32.mrf.mxu1 }
  0xdd   : > { %v703_v19 = vadd.f32 %v280_v15, %v184_v14  ;;  %v707_v23 = vadd.f32 %v292_v16, %v194_v20 }
  0xde   : > { %v282_v17 = vpop.f32.mrf.mxu0  ;;  %v294_v18 = vpop.f32.mrf.mxu1 }
  0xdf   : > { %v705_v21 = vadd.f32 %v282_v17, %v184_v14  ;;  %v709_v25 = vadd.f32 %v294_v18, %v194_v20  ;;  %v315_v38 = vmul.f32 %v703_v19, %v703_v19  ;;  %v319_v40 = vmul.f32 %v707_v23, %v707_v23 }
  0xe0   : > { %v286_v22 = vpop.f32.mrf.mxu0  ;;  %v298_v27 = vpop.f32.mrf.mxu1 }
  0xe1   : > { %v303_v26 = vadd.f32 %v705_v21, %v703_v19  ;;  %v713_v29 = vadd.f32 %v286_v22, %v189_v24  ;;  %v309_v33 = vadd.f32 %v709_v25, %v707_v23  ;;  %v316_v35 = vmul.f32 %v705_v21, %v705_v21 }
  0xe2   : > { %v288_v28 = vpop.f32.mrf.mxu0  ;;  %v300_v36 = vpop.f32.mrf.mxu1  ;;  %v299_v39 = vadd.f32 %v298_v27, %v199_v31  ;;  %v320_v44 = vmul.f32 %v709_v25, %v709_v25 }
  0xe3   : > { %v715_v30 = vadd.f32 %v288_v28, %v189_v24  ;;  %304 = vadd.xlane.f32.xlu0 %v303_v26  ;;  %v317_v37 = vmul.f32 %v713_v29, %v713_v29  ;;  %v301_v41 = vadd.f32 %v300_v36, %v199_v31  ;;  %v323_v43 = vadd.f32 %v316_v35, %v315_v38 }
  0xe4   : > { %v329_v45 = vadd.f32 %v320_v44, %v319_v40  ;;  %v321_v47 = vmul.f32 %v299_v39, %v299_v39 }
  0xe5   : > { %v306_v32 = vadd.f32 %v715_v30, %v713_v29  ;;  %v318_v34 = vmul.f32 %v715_v30, %v715_v30  ;;  %v312_v46 = vadd.f32 %v301_v41, %v299_v39  ;;  %v322_v48 = vmul.f32 %v301_v41, %v301_v41 }
  0xe7   : > { %307 = vadd.xlane.f32.xlu1 %v306_v32  ;;  %310 = vadd.xlane.f32.xlu0 %v309_v33  ;;  %v326_v42 = vadd.f32 %v318_v34, %v317_v37  ;;  %v332_v49 = vadd.f32 %v322_v48, %v321_v47 }
  0xeb   : > { %327 = vadd.xlane.f32.xlu1 %v326_v42  ;;  %324 = vadd.xlane.f32.xlu0 %v323_v43 }
  0xef   : > { %330 = vadd.xlane.f32.xlu1 %v329_v45  ;;  %313 = vadd.xlane.f32.xlu0 %v312_v46 }
  0xf3   : > { %333 = vadd.xlane.f32.xlu0 %v332_v49 }
 0x16c   : > { %v305_v50 = vpop.xlane.xlu0 %304 }
 0x170   : > { %v308_v51 = vpop.xlane.xlu1 %307  ;;  %v311_v52 = vpop.xlane.xlu0 %310 }
 0x171   : > { %v335_v53 = vadd.f32 %v308_v51, %v305_v50 }
 0x173   : > { %v336_v56 = vadd.f32 %v335_v53, %v311_v52 }
 0x174   : > { %v328_v54 = vpop.xlane.xlu1 %327  ;;  %v325_v55 = vpop.xlane.xlu0 %324 }
 0x175   : > { %v338_v59 = vadd.f32 %v328_v54, %v325_v55 }
 0x178   : > { %v331_v57 = vpop.xlane.xlu1 %330  ;;  %v314_v58 = vpop.xlane.xlu0 %313 }
 0x179   : > { %v337_v60 = vadd.f32 %v336_v56, %v314_v58  ;;  %v339_v61 = vadd.f32 %v338_v59, %v331_v57 }
 0x17b   : > { %v341_v62 = vmul.f32 0.0009765625, %v337_v60 }
 0x17c   : > { %v334_v63 = vpop.xlane.xlu0 %333 }
 0x17d   : > { %v340_v0 = vadd.f32 %v339_v61, %v334_v63  ;;  %350 = vperm.xlu1 %532, %v341_v62   ;;  %v343_v1 = vmul.f32 %v341_v62, %v341_v62 }
 0x17f   : > { %v342_v2 = vmul.f32 0.0009765625, %v340_v0 }
 0x181   : > { %v344_v3 = vsub.f32 %v342_v2, %v343_v1 }
 0x183   : > { %v345_v4 = vmax.f32 %v344_v3, 0.0 }
 0x185   : > { %v346_v5 = vadd.f32 1e-05, %v345_v4 }
 0x187   : > { %533 = vrsqrt.f32 %v346_v5 }
 0x194   : > { %v534_v6 = vpop.eup %533 }
 0x195   : > { %363 = vperm.xlu0 %531, %v534_v6  }
 0x1f8   : > { %v351_v7 = vpop.permute.xlu1 %350 }
 0x1f9   : > { %v353_v8 = vsub.f32 %v703_v19, %v351_v7  ;;  %v354_v9 = vsub.f32 %v705_v21, %v351_v7  ;;  %v355_v10 = vsub.f32 %v713_v29, %v351_v7  ;;  %v356_v11 = vsub.f32 %v715_v30, %v351_v7 }
 0x1fa   : > { %v357_v12 = vsub.f32 %v707_v23, %v351_v7  ;;  %v358_v13 = vsub.f32 %v709_v25, %v351_v7  ;;  %v359_v14 = vsub.f32 %v299_v39, %v351_v7  ;;  %v360_v15 = vsub.f32 %v301_v41, %v351_v7 }
 0x210   : > { %v364_v16 = vpop.permute.xlu0 %363 }
 0x211   : > { %v366_v17 = vmul.f32 %v364_v16, %v353_v8  ;;  %v367_v18 = vmul.f32 %v364_v16, %v354_v9  ;;  %v368_v20 = vmul.f32 %v364_v16, %v355_v10  ;;  %v369_v19 = vmul.f32 %v364_v16, %v356_v11 }
 0x212   : > { %v370_v22 = vmul.f32 %v364_v16, %v357_v12  ;;  %v371_v21 = vmul.f32 %v364_v16, %v358_v13  ;;  %v372_v24 = vmul.f32 %v364_v16, %v359_v14  ;;  %v373_v26 = vmul.f32 %v364_v16, %v360_v15 }
 0x213   : > { %v374_v27 = vmax.f32 %v366_v17, 0.0  ;;  %v375_v28 = vmax.f32 %v367_v18, 0.0  ;;  %v376_v29 = vmax.f32 %v368_v20, 0.0  ;;  %v377_v23 = vmax.f32 %v369_v19, 0.0 }
 0x214   : > { %v378_v25 = vmax.f32 %v370_v22, 0.0  ;;  %v379_v30 = vmax.f32 %v371_v21, 0.0  ;;  %v380_v31 = vmax.f32 %v372_v24, 0.0  ;;  %v381_v32 = vmax.f32 %v373_v26, 0.0 }
 0x215   : > { %382 = vst [vmem:[%s163_s30] sm:$0xff] %v374_v27  ;;  %383 = vst [vmem:[%s163_s30 + $0x8] sm:$0xff] %v375_v28 }
 0x216   : > { %384 = vst [vmem:[%s163_s30 + $0x10] sm:$0xff] %v376_v29  ;;  %385 = vst [vmem:[%s163_s30 + $0x18] sm:$0xff] %v377_v23 }
 0x217   : > { %386 = vst [vmem:[%s163_s30 + $0x20] sm:$0xff] %v378_v25  ;;  %387 = vst [vmem:[%s163_s30 + $0x28] sm:$0xff] %v379_v30 }
 0x218   : > { %388 = vst [vmem:[%s163_s30 + $0x30] sm:$0xff] %v380_v31  ;;  %389 = vst [vmem:[%s163_s30 + $0x38] sm:$0xff] %v381_v32 }
 0x219   : > { %548 = shalt.err (!%p545_p3)
}
 0x21a   : > { %s549_s17 = scalar_lea.hbm %s746_s7, 1024  ;;  %s553_s24 = scalar_lea.hbm %s795_s3, 2048 }
 0x21b   : > { %p550_p4 = scmp.ne.s32.totalorder %s746_s7, %s549_s17  ;;  %p554_p9 = scmp.lt.s32.totalorder %s746_s7, %s795_s3 }
 0x21c   : > { %p555_p10 = scmp.lt.s32.totalorder %s553_s24, %s549_s17 }
 0x21d   : > { %p551_p7 = pnand %p550_p4, %p660_p5 }
 0x21e   : > { %p556_p11 = por %p555_p10, %p554_p9 }
 0x21f   : > { %p552_p8 = pneg %p551_p7 }
 0x221   : > { %p557_p12 = pnand %p556_p11, %p552_p8 }
 0x223   : > { %560 = shalt.err (!%p557_p12)
}
 0x224   : > { %s600_s27 = smov 256   ;;  %s601_s28 = smov 16  }
 0x225   : > { %488 = dma.vmem_to_hbm [thread:$0]  (%p660_p5), %s748_s4, 1024, %s746_s7, %s752_s16, %s600_s27, %s600_s27, %s601_s28  }
 0x226 PF: > { %p494_p13 = scmp.ge.s32.totalorder %s595_s15, 2  ;;  %s419_s29 = sand.u32 1, %s583_s12  }
 0x227   : > { %s420_s30 = scalar_lea.sflag [#allocation3], %s419_s29 }
 0x228   : > { %p491_p0 = pnand %p494_p13, %p664_p6 }
 0x22a   : > { %p492_p1 = pneg %p491_p0 }
 0x22c   : > { %578 = dma.done.wait (%p492_p1), %s420_s30, 1024  }
 0x22d   : > { %580 = vsyncadd (%p492_p1), %s420_s30, 4294966272  ;;  %p13_p2 = scmp.ge.s32.totalorder %s647_s18, 4   ;;  %s798_s12 = smov %s587_s13 }
 0x22e   : > { %s799_s13 = smov %s591_s14  ;;  %s800_s14 = smov %s658_s21 }
 0x22f   : > { %s801_s15 = smov %s647_s18  ;;  %15 = sbr.rel (!%p13_p2) target bundleno = 3 (0x3), region = 67 }
 0x234   :  { %425 = vsyncpa [#allocation3], 1 }
 0x235   :  { %427 = vsyncpa [#allocation3 + $0x1], 1 }

</bundles_post_ra>
